<compile_context>
chip_gen: v6e
topology: v6e:2x2x1
jax: 0.10.0
libtpu: 0.0.40
codegen_flags: <defaults>
</compile_context>

<pallas_src>
import jax
import jax.numpy as jnp
from jax.experimental import pallas as pl
from jax.experimental.pallas import tpu as pltpu


def _or_kernel(x_ref, w_ref, o_ref):
    # x_ref: (TB, D) bf16, w_ref: (D, Lp) bf16 (resident), o_ref: (TB, Lp) f32.
    prod = jnp.dot(x_ref[...], w_ref[...], preferred_element_type=jnp.float32)
    # torch.clamp(prod, max=1) — keep the clamp in-kernel; the VPU min
    # co-issues with the MXU result pop (free in the same VLIW bundle).
    o_ref[...] = jnp.minimum(prod, 1.0).astype(o_ref.dtype)


def _round_up(a, b):
    return (a + b - 1) // b * b


def or_layer_forward(x, weight, *, tb=512, compute_dtype=jnp.bfloat16):
    """ORLayer forward: clamp(x @ weight, max=1).

    x: (B, D) float, weight: (D, L) float -> (B, L) float32.

    Note: compute_dtype=bf16 is exact for {0,1}-valued x and weight (the
    intended OR-layer regime); pass compute_dtype=jnp.float32 for general
    real-valued inputs.
    """
    B, D = x.shape
    _, L = weight.shape
    out_dtype = jnp.float32

    # Lane-dense output: pad L up to a multiple of 128.
    Lp = _round_up(max(L, 128), 128)
    # Batch tile: multiple of 8 sublanes, capped at `tb` rows per grid step.
    tb = min(tb, _round_up(B, 8))
    Bp = _round_up(B, tb)

    xc = x.astype(compute_dtype)
    wc = weight.astype(compute_dtype)
    if Bp != B:
        xc = jnp.pad(xc, ((0, Bp - B), (0, 0)))
    if Lp != L:
        wc = jnp.pad(wc, ((0, 0), (0, Lp - L)))

    out = pl.pallas_call(
        _or_kernel,
        out_shape=jax.ShapeDtypeStruct((Bp, Lp), out_dtype),
        grid=(Bp // tb,),
        in_specs=[
            # x streams tile-by-tile over the batch.
            pl.BlockSpec((tb, D), lambda i: (i, 0)),
            # weight stays resident in VMEM (same block every grid step).
            pl.BlockSpec((D, Lp), lambda i: (0, 0)),
        ],
        out_specs=pl.BlockSpec((tb, Lp), lambda i: (i, 0)),
        compiler_params=pltpu.CompilerParams(
            dimension_semantics=("parallel",),
        ),
    )(xc, wc)

    # Strip batch / lane padding (padded columns are clamp(0) = 0).
    return out[:B, :L]


def make_binary_weight(input_size, output_size, key):
    """Deterministic stand-in for BinaryWeight: a {0,1}-valued (D, L) matrix.

    # TODO(synk): BinaryWeight's exact binarization rule (e.g. sign/STE of a
    # learned latent weight) is not given in the spec; we use a fixed
    # Bernoulli {0,1} weight of the right shape.
    """
    return jax.random.bernoulli(
        key, p=0.5, shape=(input_size, output_size)
    ).astype(jnp.float32)


def reference_forward(x, weight):
    """Pure-JAX reference mirroring the PyTorch forward exactly."""
    prod = jnp.matmul(x, weight)
    return jnp.minimum(prod, 1.0)  # torch.clamp(prod, max=1)


if __name__ == "__main__":
    input_size = 32     # D
    output_size = 4     # L
    B = 8

    key = jax.random.PRNGKey(0)
    kx, kw = jax.random.split(key)
    # Binary-ish inputs make the OR/clamp semantics meaningful and keep the
    # bf16 compute path exact.
    x = jax.random.bernoulli(kx, p=0.3, shape=(B, input_size)).astype(jnp.float32)
    W = make_binary_weight(input_size, output_size, kw)

    out = or_layer_forward(x, W)
    out = jax.block_until_ready(out)

    ref = reference_forward(x, W)
    assert out.shape == (B, output_size), out.shape
    assert jnp.allclose(out, ref, atol=1e-5, rtol=1e-5), (out, ref)

    print("KERNEL_OK")
</pallas_src>

<mosaic_0001>
module attributes {stable_mosaic.version = 11 : i64} {
  func.func @_or_kernel(%arg0: i32, %arg1: memref<8x32xbf16, #tpu.memory_space<vmem>>, %arg2: memref<32x128xbf16, #tpu.memory_space<vmem>>, %arg3: memref<8x128xf32, #tpu.memory_space<vmem>>) attributes {dimension_semantics = [#tpu.dimension_semantics<parallel>], iteration_bounds = array<i64: 1>, scalar_prefetch = 0 : i64, scratch_operands = 0 : i64, tpu.core_type = #tpu.core_type<tc>, window_params = [{transform_indices = @transform_0, window_bounds = array<i64: 8, 32>}, {pipeline_mode = #tpu.pipeline_mode<synchronous>, transform_indices = @transform_1, window_bounds = array<i64: 32, 128>}, {transform_indices = @transform_2, window_bounds = array<i64: 8, 128>}]} {
    %c0 = arith.constant 0 : index
    %c0_0 = arith.constant 0 : index
    %0 = vector.load %arg1[%c0, %c0_0] : memref<8x32xbf16, #tpu.memory_space<vmem>>, vector<8x32xbf16>
    %c0_1 = arith.constant 0 : index
    %c0_2 = arith.constant 0 : index
    %1 = vector.load %arg2[%c0_1, %c0_2] : memref<32x128xbf16, #tpu.memory_space<vmem>>, vector<32x128xbf16>
    %cst = arith.constant dense<0.000000e+00> : vector<8x128xf32>
    %2 = tpu.matmul %0, %1, %cst {dimension_numbers = #tpu.dot_dimension_numbers<[1], [0], [0], [1], [0, 0, 1, 1], [], []>} : vector<8x32xbf16>, vector<32x128xbf16>, vector<8x128xf32> -> vector<8x128xf32>
    %cst_3 = arith.constant 1.000000e+00 : f32
    %3 = vector.broadcast %cst_3 : f32 to vector<8x128xf32>
    %4 = arith.minimumf %2, %3 : vector<8x128xf32>
    %c0_4 = arith.constant 0 : index
    %c0_5 = arith.constant 0 : index
    %5 = vector.load %arg3[%c0_4, %c0_5] : memref<8x128xf32, #tpu.memory_space<vmem>>, vector<8x128xf32>
    tpu.vector_store %arg3[%c0_4, %c0_5], %4 {strides = array<i32>} : memref<8x128xf32, #tpu.memory_space<vmem>>, vector<8x128xf32>,
    return
  }
  func.func @transform_0(%arg0: i32) -> (i32, i32) {
    %c0_i32 = arith.constant 0 : i32
    %c0_i32_0 = arith.constant 0 : i32
    return %arg0, %c0_i32 : i32, i32
  }
  func.func @transform_1(%arg0: i32) -> (i32, i32) {
    %c0_i32 = arith.constant 0 : i32
    %c0_i32_0 = arith.constant 0 : i32
    %c0_i32_1 = arith.constant 0 : i32
    return %c0_i32, %c0_i32_0 : i32, i32
  }
  func.func @transform_2(%arg0: i32) -> (i32, i32) {
    %c0_i32 = arith.constant 0 : i32
    %c0_i32_0 = arith.constant 0 : i32
    return %arg0, %c0_i32 : i32, i32
  }
}

</mosaic_0001>

<bundles_post_ra>
// kernel: tpu_custom_call.1
= control target key start
LH: loop header
LB: loop body
LE: loop exit
PB: predicated region body
PF: predicated region fallthrough
CT: control target
= control target key end

     0   :  { %7 = vsyncpa [#allocation3], 0  ;;  %s238_s0 = inlined_call_operand.hbm [shape: bf16[8,32], index: 0, kind: input, shape index: {}]   ;;  %s239_s1 = inlined_call_operand.hbm [shape: bf16[32,128], index: 1, kind: input, shape index: {}]   ;;  %s240_s2 = inlined_call_operand.hbm [shape: f32[8,128], index: 2, kind: output, shape index: {}]  }
   0x1   :  { %8 = vsyncpa [#allocation6], 0 }
   0x2   :  { %9 = vsyncpa [#allocation4], 0  ;;  %s207_s9 = smov [#allocation2]   ;;  %s208_s11 = smov [#allocation5]  }
   0x3   :  { %s16_s10 = sshll.u32 %s207_s9, 4  ;;  %s25_s12 = sshll.u32 %s208_s11, 4  ;;  %s17_s10 = int_to_ptr.vmem [resolvable:$true] %s16_s10  ;;  %s26_s12 = int_to_ptr.vmem [resolvable:$true] %s25_s12 }
   0x4   :  { %s149_s13 = scalar_lea.vmem %s17_s10, 64  ;;  %p154_p1 = scmp.lt.s32.totalorder %s17_s10, %s17_s10 }
   0x5   :  { %p150_p0 = scmp.ne.s32.totalorder %s17_s10, %s149_s13  ;;  %p155_p2 = scmp.lt.s32.totalorder %s149_s13, %s149_s13 }
   0x7   :  { %p156_p3 = por %p155_p2, %p154_p1 }
   0x9   :  { %p157_p4 = pnand %p156_p3, %p150_p0 }
   0xb   :  { %160 = shalt.err (!%p157_p4)
}
   0xc   :  { %19 = dma.hbm_to_vmem [thread:$0]  %s238_s0, 64, %s17_s10, [#allocation3]  }
   0xd   :  { %s169_s16 = scalar_lea.vmem %s26_s12, 256  ;;  %p174_p6 = scmp.lt.s32.totalorder %s26_s12, %s26_s12 }
   0xe   :  { %p170_p5 = scmp.ne.s32.totalorder %s26_s12, %s169_s16  ;;  %p175_p7 = scmp.lt.s32.totalorder %s169_s16, %s169_s16 }
  0x10   :  { %p176_p8 = por %p175_p7, %p174_p6 }
  0x12   :  { %p177_p9 = pnand %p176_p8, %p170_p5 }
  0x14   :  { %180 = shalt.err (!%p177_p9)
}
  0x15   :  { %s209_s17 = smov 64   ;;  %s210_s18 = smov 4  }
  0x16   :  { %31 = dma.hbm_to_vmem [thread:$0]  %s239_s1, 256, %s26_s12, [#allocation6], %s209_s17, %s209_s17, %s210_s18  }
  0x17   :  { %201 = dma.done.wait [#allocation3], 64  }
  0x18   :  { %202 = vsyncadd [#allocation3], 4294967232 }
  0x19   :  { %203 = dma.done.wait [#allocation6], 256  }
  0x1a   :  { %204 = vsyncadd [#allocation6], 4294967040  ;;  %v211_v0 = vmov 0.0   ;;  %vm212_vm0 = vmmov 0   ;;  %v139_v1 = vld [vmem:[#allocation5 + $0x8] sm:$0xff]   ;;  %v140_v2 = vld [vmem:[#allocation5] sm:$0xff]  }
  0x1b   :  { %124 = vmatprep.subr.bf16.mxu0 %v211_v0  ;;  %128 = vmatprep.mubr.msk.bf16.mxu0 %vm212_vm0, %v211_v0  ;;  %v39_v3 = vld [vmem:[#allocation2] sm:$0xf]  ;;  %vm56_vm1 = vcmask 261120   ;;  %s213_s0 = smov [#allocation7]  }
  0x1c   :  { %125 = vmatpush3.bf16.msra.mxu0 %v139_v1  ;;  %s108_s21 = sshll.u32 %s213_s0, 4  ;;  %s109_s21 = int_to_ptr.vmem [resolvable:$true] %s108_s21 }
  0x1d   :  { %126 = vmatprep.subr.bf16.mxu0 %v211_v0  ;;  %s181_s1 = scalar_lea.vmem %s109_s21, 128  ;;  %p186_p11 = scmp.lt.s32.totalorder %s109_s21, %s109_s21 }
  0x1e   :  { %p182_p10 = scmp.ne.s32.totalorder %s109_s21, %s181_s1  ;;  %p187_p12 = scmp.lt.s32.totalorder %s181_s1, %s181_s1 }
  0x20   :  { %127 = vmatpush3.bf16.msra.mxu0 %v140_v2  ;;  %p188_p13 = por %p187_p12, %p186_p11 }
  0x22   :  { %p189_p0 = pnand %p188_p13, %p182_p10 }
  0x23   :  { %129 = vmatmul.mubr.msk.bf16.vlgmr.msra.gmra.mxu0 %vm56_vm1, %v39_v3 }
  0xe3   :  { %v94_v4 = vpop.f32.mrf.mxu0 }
  0xe4   :  { %v100_v5 = vmin.f32 %v94_v4, 1.0 }
  0xe5   :  { %v130_v6 = vpop.f32.mrf.mxu0 }
  0xe6   :  { %101 = vst [vmem:[#allocation7] sm:$0xff] %v100_v5 }
  0xe7   :  { %v97_v7 = vpop.f32.mrf.mxu0 }
  0xe8   :  { %192 = shalt.err (!%p189_p0)
}
  0xe9   :  { %111 = dma.vmem_to_hbm [thread:$0]  %s109_s21, 128, %s240_s2, [#allocation4]   ;;  %v131_v8 = vpop.f32.mrf.mxu0 }
  0xea   :  { %205 = dma.done.wait [#allocation4], 128  }
  0xeb   :  { %206 = vsyncadd [#allocation4], 4294967168 }
  0xec   :  { %115 = vsyncpa [#allocation3], 1 }
  0xed   :  { %116 = vsyncpa [#allocation6], 1 }
  0xee   :  { %117 = vsyncpa [#allocation4], 1 }

</bundles_post_ra>
